<compile_context>
chip_gen: v7x
topology: tpu7x:2x2x1
jax: 0.10.0
libtpu: 0.0.40
codegen_flags: <defaults>
</compile_context>

<pallas_src>
import math

import jax
import jax.numpy as jnp
from jax.experimental import pallas as pl
from jax.experimental.pallas import tpu as pltpu


FREQ_EMB_SIZE = 1280        # frequency_embedding_size (module default)
HIDDEN_SIZE = 128           # hidden_size (lane-aligned)
MAX_PERIOD = 10000.0

# Odd frequency_embedding_size would require the module's zero-pad column;
# that column multiplies a zero activation, so for even dims (the default
# 1280) nothing is needed.  Keep it even here.
assert FREQ_EMB_SIZE % 2 == 0


def timestep_embedder_kernel(t_ref, freqs_ref, w1c_ref, w1s_ref, b1_ref,
                             w2_ref, b2_ref, o_ref):
    # t_ref:     (N, 1)        f32
    # freqs_ref: (1, half)     f32
    # w1c_ref:   (half, H)     bf16   (rows of w1 that hit cos(args))
    # w1s_ref:   (half, H)     bf16   (rows of w1 that hit sin(args))
    # b1_ref:    (1, H)        f32
    # w2_ref:    (H, H)        bf16
    # b2_ref:    (1, H)        f32
    # o_ref:     (N, H)        f32
    t = t_ref[...]                                  # (N, 1)
    freqs = freqs_ref[...]                          # (1, half)
    args = t * freqs                                # (N, half) broadcast outer product

    # Split first matmul over the cos/sin halves (no concatenate, no
    # (N, FREQ) intermediate).  emb @ w1 == cos @ w1[:half] + sin @ w1[half:].
    cos_a = jnp.cos(args).astype(jnp.bfloat16)
    sin_a = jnp.sin(args).astype(jnp.bfloat16)
    h = jnp.dot(cos_a, w1c_ref[...], preferred_element_type=jnp.float32)
    h = h + jnp.dot(sin_a, w1s_ref[...], preferred_element_type=jnp.float32)
    h = h + b1_ref[...]

    # SiLU: h * sigmoid(h); divide goes to the EUP slot.
    sig = pl.reciprocal(1.0 + jnp.exp(-h), approx=True)
    h = h * sig

    # Second Linear.
    out = jnp.dot(h.astype(jnp.bfloat16), w2_ref[...],
                  preferred_element_type=jnp.float32)
    out = out + b2_ref[...]
    o_ref[...] = out


def timestep_embedder(t, freqs, w1_cos, w1_sin, b1, w2, b2):
    """t: (N,) float32 -> (N, HIDDEN_SIZE) float32.

    w1_cos / w1_sin / w2 are expected in bfloat16 (storage dtype); biases and
    freqs in float32.
    """
    n = t.shape[0]
    t2d = t.astype(jnp.float32).reshape(n, 1)
    vmem = pl.BlockSpec(memory_space=pltpu.MemorySpace.VMEM)
    return pl.pallas_call(
        timestep_embedder_kernel,
        out_shape=jax.ShapeDtypeStruct((n, HIDDEN_SIZE), jnp.float32),
        in_specs=[vmem] * 7,
        out_specs=vmem,
    )(t2d, freqs, w1_cos, w1_sin, b1, w2, b2)


def make_freqs(dim=FREQ_EMB_SIZE, max_period=MAX_PERIOD):
    # Matches the PyTorch module:
    #   2 * 3.14159 * exp(-ln(max_period) * (arange(half) - half/3) / half)
    half = dim // 2
    idx = jnp.arange(half, dtype=jnp.float32)
    freqs = 2.0 * 3.14159 * jnp.exp(
        -math.log(max_period) * (idx - half / 3.0) / half)
    return freqs.reshape(1, half)


def reference_forward(t, w1, b1, w2, b2,
                      dim=FREQ_EMB_SIZE, max_period=MAX_PERIOD):
    """Pure-JAX f32 reference mirroring the PyTorch module semantics."""
    half = dim // 2
    idx = jnp.arange(half, dtype=jnp.float32)
    freqs = 2.0 * 3.14159 * jnp.exp(
        -math.log(max_period) * (idx - half / 3.0) / half)
    args = t.astype(jnp.float32)[:, None] * freqs[None, :]
    emb = jnp.concatenate([jnp.cos(args), jnp.sin(args)], axis=-1)
    h = emb @ w1 + b1
    h = h * jax.nn.sigmoid(h)
    return h @ w2 + b2


if __name__ == "__main__":
    key = jax.random.PRNGKey(0)
    k_t, k_w1, k_b1, k_w2, k_b2 = jax.random.split(key, 5)

    N = 8
    # Fractional timesteps, like diffusion timesteps.
    t = jax.random.uniform(k_t, (N,), dtype=jnp.float32) * 1000.0

    # Canonical f32 parameters, stored as (in_features, out_features)
    # (transpose of nn.Linear's weight layout) so the kernel does x @ W + b.
    w1 = jax.random.normal(k_w1, (FREQ_EMB_SIZE, HIDDEN_SIZE),
                           dtype=jnp.float32) * 0.02
    b1 = jax.random.normal(k_b1, (1, HIDDEN_SIZE), dtype=jnp.float32) * 0.01
    w2 = jax.random.normal(k_w2, (HIDDEN_SIZE, HIDDEN_SIZE),
                           dtype=jnp.float32) * 0.02
    b2 = jax.random.normal(k_b2, (1, HIDDEN_SIZE), dtype=jnp.float32) * 0.01

    # One-time weight prep for the kernel: split w1 over the cos/sin halves and
    # store matmul weights in bf16 (halves the dominant w1 DMA).
    half = FREQ_EMB_SIZE // 2
    w1_cos = w1[:half].astype(jnp.bfloat16)
    w1_sin = w1[half:].astype(jnp.bfloat16)
    w2_bf16 = w2.astype(jnp.bfloat16)
    freqs = make_freqs()

    out = timestep_embedder(t, freqs, w1_cos, w1_sin, b1, w2_bf16, b2)
    out = jax.block_until_ready(out)

    ref = reference_forward(t, w1, b1, w2, b2)
    ref = jax.block_until_ready(ref)

    assert out.shape == (N, HIDDEN_SIZE)
    # Tolerance relaxed for bf16 matmul weights vs. the f32 reference.
    max_err = float(jnp.max(jnp.abs(out - ref)))
    assert jnp.allclose(out, ref, atol=2e-2, rtol=2e-2), max_err

    print("KERNEL_OK")
</pallas_src>

<mosaic_0001>
module attributes {stable_mosaic.version = 11 : i64} {
  func.func @timestep_embedder_kernel(%arg0: memref<8x1xf32, #tpu.memory_space<vmem>>, %arg1: memref<1x640xf32, #tpu.memory_space<vmem>>, %arg2: memref<640x128xbf16, #tpu.memory_space<vmem>>, %arg3: memref<640x128xbf16, #tpu.memory_space<vmem>>, %arg4: memref<1x128xf32, #tpu.memory_space<vmem>>, %arg5: memref<128x128xbf16, #tpu.memory_space<vmem>>, %arg6: memref<1x128xf32, #tpu.memory_space<vmem>>, %arg7: memref<8x128xf32, #tpu.memory_space<vmem>>) attributes {dimension_semantics = [], scalar_prefetch = 0 : i64, scratch_operands = 0 : i64, tpu.core_type = #tpu.core_type<tc>} {
    %c0 = arith.constant 0 : index
    %c0_0 = arith.constant 0 : index
    %0 = vector.load %arg0[%c0, %c0_0] : memref<8x1xf32, #tpu.memory_space<vmem>>, vector<8x1xf32>
    %c0_1 = arith.constant 0 : index
    %c0_2 = arith.constant 0 : index
    %1 = vector.load %arg1[%c0_1, %c0_2] : memref<1x640xf32, #tpu.memory_space<vmem>>, vector<1x640xf32>
    %2 = vector.broadcast %0 : vector<8x1xf32> to vector<8x640xf32>
    %3 = vector.broadcast %1 : vector<1x640xf32> to vector<8x640xf32>
    %4 = arith.mulf %2, %3 : vector<8x640xf32>
    %5 = math.cos %4 : vector<8x640xf32>
    %6 = arith.truncf %5 : vector<8x640xf32> to vector<8x640xbf16>
    %7 = math.sin %4 : vector<8x640xf32>
    %8 = arith.truncf %7 : vector<8x640xf32> to vector<8x640xbf16>
    %c0_3 = arith.constant 0 : index
    %c0_4 = arith.constant 0 : index
    %9 = vector.load %arg2[%c0_3, %c0_4] : memref<640x128xbf16, #tpu.memory_space<vmem>>, vector<640x128xbf16>
    %cst = arith.constant dense<0.000000e+00> : vector<8x128xf32>
    %10 = tpu.matmul %6, %9, %cst {dimension_numbers = #tpu.dot_dimension_numbers<[1], [0], [0], [1], [0, 0, 1, 1], [], []>} : vector<8x640xbf16>, vector<640x128xbf16>, vector<8x128xf32> -> vector<8x128xf32>
    %c0_5 = arith.constant 0 : index
    %c0_6 = arith.constant 0 : index
    %11 = vector.load %arg3[%c0_5, %c0_6] : memref<640x128xbf16, #tpu.memory_space<vmem>>, vector<640x128xbf16>
    %cst_7 = arith.constant dense<0.000000e+00> : vector<8x128xf32>
    %12 = tpu.matmul %8, %11, %cst_7 {dimension_numbers = #tpu.dot_dimension_numbers<[1], [0], [0], [1], [0, 0, 1, 1], [], []>} : vector<8x640xbf16>, vector<640x128xbf16>, vector<8x128xf32> -> vector<8x128xf32>
    %13 = arith.addf %10, %12 : vector<8x128xf32>
    %c0_8 = arith.constant 0 : index
    %c0_9 = arith.constant 0 : index
    %14 = vector.load %arg4[%c0_8, %c0_9] : memref<1x128xf32, #tpu.memory_space<vmem>>, vector<1x128xf32>
    %15 = vector.broadcast %14 : vector<1x128xf32> to vector<8x128xf32>
    %16 = arith.addf %13, %15 : vector<8x128xf32>
    %cst_10 = arith.constant 0.000000e+00 : f32
    %17 = vector.broadcast %cst_10 : f32 to vector<8x128xf32>
    %18 = arith.subf %17, %16 : vector<8x128xf32>
    %19 = math.exp %18 : vector<8x128xf32>
    %cst_11 = arith.constant 1.000000e+00 : f32
    %20 = vector.broadcast %cst_11 : f32 to vector<8x128xf32>
    %21 = arith.addf %20, %19 : vector<8x128xf32>
    %22 = tpu.reciprocal %21 {approx = true} : vector<8x128xf32> -> vector<8x128xf32>
    %23 = arith.mulf %16, %22 : vector<8x128xf32>
    %24 = arith.truncf %23 : vector<8x128xf32> to vector<8x128xbf16>
    %c0_12 = arith.constant 0 : index
    %c0_13 = arith.constant 0 : index
    %25 = vector.load %arg5[%c0_12, %c0_13] : memref<128x128xbf16, #tpu.memory_space<vmem>>, vector<128x128xbf16>
    %cst_14 = arith.constant dense<0.000000e+00> : vector<8x128xf32>
    %26 = tpu.matmul %24, %25, %cst_14 {dimension_numbers = #tpu.dot_dimension_numbers<[1], [0], [0], [1], [0, 0, 1, 1], [], []>} : vector<8x128xbf16>, vector<128x128xbf16>, vector<8x128xf32> -> vector<8x128xf32>
    %c0_15 = arith.constant 0 : index
    %c0_16 = arith.constant 0 : index
    %27 = vector.load %arg6[%c0_15, %c0_16] : memref<1x128xf32, #tpu.memory_space<vmem>>, vector<1x128xf32>
    %28 = vector.broadcast %27 : vector<1x128xf32> to vector<8x128xf32>
    %29 = arith.addf %26, %28 : vector<8x128xf32>
    %c0_17 = arith.constant 0 : index
    %c0_18 = arith.constant 0 : index
    %30 = vector.load %arg7[%c0_17, %c0_18] : memref<8x128xf32, #tpu.memory_space<vmem>>, vector<8x128xf32>
    tpu.vector_store %arg7[%c0_17, %c0_18], %29 {strides = array<i32>} : memref<8x128xf32, #tpu.memory_space<vmem>>, vector<8x128xf32>,
    return
  }
}

</mosaic_0001>

<bundles_post_ra>
// kernel: tpu_custom_call.1
= control target key start
LH: loop header
LB: loop body
LE: loop exit
PB: predicated region body
PF: predicated region fallthrough
CT: control target
= control target key end

     0   :  { %12 = vsyncpa [#allocation3], 0  ;;  %s3442_s0 = inlined_call_operand.vmem [shape: f32[8,1], index: 0, kind: input, shape index: {}]   ;;  %s3443_s1 = inlined_call_operand.vmem [shape: f32[1,640], index: 1, kind: input, shape index: {}]   ;;  %s3444_s2 = inlined_call_operand.hbm [shape: bf16[640,128], index: 2, kind: input, shape index: {}]   ;;  %s3445_s3 = inlined_call_operand.hbm [shape: bf16[640,128], index: 3, kind: input, shape index: {}]   ;;  %s3446_s4 = inlined_call_operand.vmem [shape: f32[1,128], index: 4, kind: input, shape index: {}]   ;;  %s3447_s5 = inlined_call_operand.hbm [shape: bf16[128,128], index: 5, kind: input, shape index: {}]   ;;  %s3448_s6 = inlined_call_operand.vmem [shape: f32[1,128], index: 6, kind: input, shape index: {}]   ;;  %s3449_s7 = inlined_call_operand.hbm [shape: f32[8,128], index: 7, kind: output, shape index: {}]  }
   0x1   :  { %13 = vsyncpa [#allocation6], 0 }
   0x2   :  { %14 = vsyncpa [#allocation4], 0  ;;  %s2722_s24 = smov [#allocation5]   ;;  %s2723_s26 = smov [#allocation2]  }
   0x3   :  { %s36_s25 = sshll.u32 %s2722_s24, 4  ;;  %s24_s27 = sshll.u32 %s2723_s26, 4  ;;  %s37_s25 = int_to_ptr.vmem [resolvable:$true] %s36_s25  ;;  %s2777_s27 = int_to_ptr.vmem [resolvable:$true] %s24_s27 }
   0x4   :  { %s2628_s30 = scalar_lea.hbm %s3445_s3, 5120 }
   0x5   :  { %p2629_p0 = scmp.ne.s32.totalorder %s3445_s3, %s2628_s30  ;;  %p2632_p1 = scmp.lt.u32.totalorder %s2628_s30, %s3445_s3 }
   0x7   :  { %p2634_p2 = pnand %p2632_p1, %p2629_p0 }
   0x9   :  { %2637 = shalt.err (!%p2634_p2)
}
   0xa   :  { %s2638_s12 = scalar_lea.vmem %s37_s25, 5120  ;;  %p2643_p4 = scmp.lt.s32.totalorder %s37_s25, %s37_s25 }
   0xb   :  { %p2639_p3 = scmp.ne.s32.totalorder %s37_s25, %s2638_s12  ;;  %p2644_p5 = scmp.lt.s32.totalorder %s2638_s12, %s2638_s12 }
   0xd   :  { %p2645_p6 = por %p2644_p5, %p2643_p4 }
   0xf   :  { %p2646_p7 = pnand %p2645_p6, %p2639_p3 }
  0x11   :  { %2649 = shalt.err (!%p2646_p7)
}
  0x12   :  { %s2724_s13 = smov 64   ;;  %s2725_s14 = smov 4  }
  0x13   :  { %42 = dma.hbm_to_vmem [thread:$0]  %s3445_s3, 5120, %s37_s25, [#allocation6], %s2724_s13, %s2724_s13, %s2725_s14  }
  0x14   :  { %s2650_s19 = scalar_lea.hbm %s3444_s2, 5120 }
  0x15   :  { %p2651_p8 = scmp.ne.s32.totalorder %s3444_s2, %s2650_s19  ;;  %p2654_p9 = scmp.lt.u32.totalorder %s2650_s19, %s3444_s2 }
  0x17   :  { %p2656_p10 = pnand %p2654_p9, %p2651_p8 }
  0x19   :  { %2659 = shalt.err (!%p2656_p10)
}
  0x1a   :  { %s2660_s24 = scalar_lea.vmem %s2777_s27, 5120  ;;  %p2665_p12 = scmp.lt.s32.totalorder %s2777_s27, %s2777_s27 }
  0x1b   :  { %p2661_p11 = scmp.ne.s32.totalorder %s2777_s27, %s2660_s24  ;;  %p2666_p13 = scmp.lt.s32.totalorder %s2660_s24, %s2660_s24 }
  0x1d   :  { %p2667_p0 = por %p2666_p13, %p2665_p12 }
  0x1f   :  { %p2668_p1 = pnand %p2667_p0, %p2661_p11 }
  0x21   :  { %2671 = shalt.err (!%p2668_p1)
}
  0x22   :  { %30 = dma.hbm_to_vmem [thread:$0]  %s3444_s2, 5120, %s2777_s27, [#allocation3], %s2724_s13, %s2724_s13, %s2725_s14  }
  0x23   :  { %s2726_s26 = smov [#allocation7]   ;;  %s2672_s8 = scalar_lea.hbm %s3447_s5, 1024 }
  0x24   :  { %s50_s28 = sshll.u32 %s2726_s26, 4  ;;  %p2673_p2 = scmp.ne.s32.totalorder %s3447_s5, %s2672_s8  ;;  %s51_s28 = int_to_ptr.vmem [resolvable:$true] %s50_s28 }
  0x25   :  { %p2676_p3 = scmp.lt.u32.totalorder %s2672_s8, %s3447_s5 }
  0x27   :  { %p2678_p4 = pnand %p2676_p3, %p2673_p2 }
  0x29   :  { %2681 = shalt.err (!%p2678_p4)
}
  0x2a   :  { %s2682_s15 = scalar_lea.vmem %s51_s28, 1024  ;;  %p2687_p6 = scmp.lt.s32.totalorder %s51_s28, %s51_s28 }
  0x2b   :  { %p2683_p5 = scmp.ne.s32.totalorder %s51_s28, %s2682_s15  ;;  %p2688_p7 = scmp.lt.s32.totalorder %s2682_s15, %s2682_s15 }
  0x2d   :  { %p2689_p8 = por %p2688_p7, %p2687_p6 }
  0x2f   :  { %p2690_p9 = pnand %p2689_p8, %p2683_p5 }
  0x31   :  { %2693 = shalt.err (!%p2690_p9)
}
  0x32   :  { %56 = dma.hbm_to_vmem [thread:$0]  %s3447_s5, 1024, %s51_s28, [#allocation6], %s2724_s13, %s2724_s13, %s2725_s14  }
  0x33   :  { %2716 = dma.done.wait [#allocation3], 5120  }
  0x34   :  { %2717 = vsyncadd [#allocation3], 4294962176 }
  0x35   :  { %2718 = dma.done.wait [#allocation6], 6144  }
  0x36   :  { %2719 = vsyncadd [#allocation6], 4294961152  ;;  %v77_v0 = vlaneseq  ;;  %v2727_v1 = vmov 0   ;;  %v69_v5 = vld [vmem:[%s3442_s0] sm:$0xff]  ;;  %v2520_v13 = vld [vmem:[#allocation5 + $0x48] sm:$0xff]   ;;  %v2728_v42 = vmov 0.0  }
  0x37   :  { %2515 = vset.pattern.permute.xlu0 %v2727_v1  ;;  %v2839_v6 = vld [vmem:[%s3443_s1] sm:$0x1f]  ;;  %v2521_v14 = vld [vmem:[#allocation5 + $0xc8] sm:$0xff]   ;;  %v2524_v17 = vld [vmem:[#allocation5 + $0x50] sm:$0xff]  }
  0x38   :  { %v2829_v2 = vshrl.u32 %v77_v0, 7  ;;  %73 = vperm.xlu0 %2515, %v69_v5   ;;  %v2516_v9 = vld [vmem:[#allocation5 + $0x40] sm:$0xff]   ;;  %v2522_v15 = vld [vmem:[#allocation5 + $0x8] sm:$0xff]   ;;  %v2525_v18 = vld [vmem:[#allocation5 + $0xd0] sm:$0xff]  }
  0x39   :  { %v2517_v10 = vld [vmem:[#allocation5 + $0xc0] sm:$0xff]   ;;  %2305 = vmatprep.subr.bf16.mxu0 %v2516_v9  ;;  %v2523_v16 = vld [vmem:[#allocation5 + $0x88] sm:$0xff]   ;;  %v2526_v19 = vld [vmem:[#allocation5 + $0x10] sm:$0xff]  }
  0x3a   :  { %v87_v3 = vsub.s32 2, %v2829_v2  ;;  %v95_v4 = vsub.s32 4, %v2829_v2  ;;  %v2518_v11 = vld [vmem:[#allocation5] sm:$0xff]   ;;  %2327 = vmatprep.subr.bf16.mxu1 %v2517_v10  ;;  %v2527_v20 = vld [vmem:[#allocation5 + $0x90] sm:$0xff]   ;;  %v2528_v21 = vld [vmem:[#allocation5 + $0x58] sm:$0xff]   ;;  %v83_v43 = vsub.s32 1, %v2829_v2 }
  0x3b   :  { %v2519_v12 = vld [vmem:[#allocation5 + $0x80] sm:$0xff]   ;;  %2306 = vmatpush3.bf16.msra.mxu0 %v2518_v11  ;;  %v2529_v22 = vld [vmem:[#allocation5 + $0xd8] sm:$0xff]   ;;  %v2536_v29 = vld [vmem:[#allocation5 + $0x68] sm:$0xff]   ;;  %v91_v44 = vsub.s32 3, %v2829_v2  ;;  %v79_v45 = vsub.s32 0, %v2829_v2 }
  0x3c   :  { %v2842_v7 = vrot.slane %v2839_v6, %v87_v3  ;;  %v2845_v8 = vrot.slane %v2839_v6, %v95_v4  ;;  %2328 = vmatpush3.bf16.msra.mxu1 %v2519_v12  ;;  %2307 = vmatprep.subr.bf16.mxu0 %v2520_v13  ;;  %v2530_v23 = vld [vmem:[#allocation5 + $0x18] sm:$0xff]   ;;  %v2532_v25 = vld [vmem:[#allocation5 + $0x60] sm:$0xff]   ;;  %v2537_v30 = vld [vmem:[#allocation5 + $0xe8] sm:$0xff]   ;;  %v84_v46 = vrot.slane %v2839_v6, %v83_v43 }
  0x3d   :  { %2329 = vmatprep.subr.bf16.mxu1 %v2521_v14  ;;  %v2531_v24 = vld [vmem:[#allocation5 + $0x98] sm:$0xff]   ;;  %v2533_v26 = vld [vmem:[#allocation5 + $0xe0] sm:$0xff]   ;;  %v2538_v31 = vld [vmem:[#allocation5 + $0x28] sm:$0xff]   ;;  %v92_v47 = vrot.slane %v2839_v6, %v91_v44  ;;  %v80_v48 = vrot.slane %v2839_v6, %v79_v45  ;;  %v2733_v45 = vmov 2131351028  }
  0x3e   :  { %v2534_v27 = vld [vmem:[#allocation5 + $0x20] sm:$0xff]   ;;  %v2539_v32 = vld [vmem:[#allocation5 + $0xa8] sm:$0xff]   ;;  %v2540_v33 = vld [vmem:[#allocation5 + $0x70] sm:$0xff]  }
  0x3f   :  { %2308 = vmatpush3.bf16.msra.mxu0 %v2522_v15  ;;  %v2535_v28 = vld [vmem:[#allocation5 + $0xa0] sm:$0xff]   ;;  %v2541_v34 = vld [vmem:[#allocation5 + $0xf0] sm:$0xff]   ;;  %v2544_v37 = vld [vmem:[#allocation5 + $0x78] sm:$0xff]  }
  0x40   :  { %2330 = vmatpush3.bf16.msra.mxu1 %v2523_v16  ;;  %2309 = vmatprep.subr.bf16.mxu0 %v2524_v17  ;;  %v2542_v35 = vld [vmem:[#allocation5 + $0x30] sm:$0xff]   ;;  %v2545_v38 = vld [vmem:[#allocation5 + $0xf8] sm:$0xff]   ;;  %v2548_v41 = vld [vmem:[#allocation2 + $0x40] sm:$0xff]  }
  0x41   :  { %2331 = vmatprep.subr.bf16.mxu1 %v2525_v18  ;;  %v2543_v36 = vld [vmem:[#allocation5 + $0xb0] sm:$0xff]   ;;  %v2546_v39 = vld [vmem:[#allocation5 + $0x38] sm:$0xff]  }
  0x42   :  { %v2547_v40 = vld [vmem:[#allocation5 + $0xb8] sm:$0xff]  }
  0x43   :  { %2310 = vmatpush3.bf16.msra.mxu0 %v2526_v19 }
  0x44   :  { %2332 = vmatpush3.bf16.msra.mxu1 %v2527_v20  ;;  %2311 = vmatprep.subr.bf16.mxu0 %v2528_v21  ;;  %v2729_v21 = vmov 920167782  }
  0x45   :  { %2333 = vmatprep.subr.bf16.mxu1 %v2529_v22 }
  0x47   :  { %2312 = vmatpush3.bf16.msra.mxu0 %v2530_v23  ;;  %v2730_v23 = vmov 1326507024  }
  0x48   :  { %2334 = vmatpush3.bf16.msra.mxu1 %v2531_v24  ;;  %2313 = vmatprep.subr.bf16.mxu0 %v2532_v25 }
  0x49   :  { %2335 = vmatprep.subr.bf16.mxu1 %v2533_v26 }
  0x4b   :  { %2314 = vmatpush3.bf16.msra.mxu0 %v2534_v27 }
  0x4c   :  { %2336 = vmatpush3.bf16.msra.mxu1 %v2535_v28  ;;  %2315 = vmatprep.subr.bf16.mxu0 %v2536_v29 }
  0x4d   :  { %2337 = vmatprep.subr.bf16.mxu1 %v2537_v30 }
  0x4f   :  { %2316 = vmatpush3.bf16.msra.mxu0 %v2538_v31 }
  0x50   :  { %2338 = vmatpush3.bf16.msra.mxu1 %v2539_v32  ;;  %2317 = vmatprep.subr.bf16.mxu0 %v2540_v33 }
  0x51   :  { %2339 = vmatprep.subr.bf16.mxu1 %v2541_v34  ;;  %v2731_v34 = vmov 683565275  }
  0x53   :  { %2318 = vmatpush3.bf16.msra.mxu0 %v2542_v35 }
  0x54   :  { %2340 = vmatpush3.bf16.msra.mxu1 %v2543_v36  ;;  %2319 = vmatprep.subr.bf16.mxu0 %v2544_v37 }
  0x55   :  { %2341 = vmatprep.subr.bf16.mxu1 %v2545_v38 }
  0x57   :  { %2320 = vmatpush3.bf16.msra.mxu0 %v2546_v39 }
  0x58   :  { %2342 = vmatpush3.bf16.msra.mxu1 %v2547_v40  ;;  %2420 = vmatprep.subr.bf16.mxu0 %v2728_v42  ;;  %v2732_v40 = vmov 2475754826  }
  0x59   :  { %2358 = vmatprep.subr.bf16.mxu1 %v2548_v41 }
  0xb7   :  { %v74_v49 = vpop.permute.xlu0 %73 }
  0xb8   :  { %v2854_v50 = vmul.f32 %v84_v46, %v74_v49  ;;  %v2857_v51 = vmul.f32 %v2842_v7, %v74_v49  ;;  %v2859_v52 = vmul.f32 %v92_v47, %v74_v49  ;;  %v2862_v53 = vmul.f32 %v2845_v8, %v74_v49 }
  0xb9   :  { %v2864_v54 = vmul.f32 %v80_v48, %v74_v49 }
  0xba   :  { %v213_v55 = vand.u32 2139095040, %v2854_v50  ;;  %v316_v56 = vand.u32 2139095040, %v2857_v51  ;;  %v419_v57 = vand.u32 2139095040, %v2859_v52  ;;  %v522_v58 = vand.u32 2139095040, %v2862_v53 }
  0xbb   :  { %v110_v63 = vand.u32 2139095040, %v2864_v54  ;;  %v519_v3 = vand.u32 2147483647, %v2862_v53  ;;  %v210_v12 = vand.u32 2147483647, %v2854_v50 }
  0xbc   :  { %v214_v59 = vshrl.u32 %v213_v55, 23  ;;  %v317_v60 = vshrl.u32 %v316_v56, 23  ;;  %v420_v61 = vshrl.u32 %v419_v57, 23  ;;  %v523_v62 = vshrl.u32 %v522_v58, 23 }
  0xbd   :  { %v111_v7 = vshrl.u32 %v110_v63, 23  ;;  %v526_v11 = vand.u32 8388607, %v519_v3  ;;  %v2887_v19 = vand.u32 8388607, %v210_v12 }
  0xbe   :  { %v2179_v0 = vadd.s32 4294967169, %v214_v59  ;;  %v2183_v1 = vadd.s32 4294967169, %v317_v60  ;;  %v2187_v2 = vadd.s32 4294967169, %v420_v61  ;;  %v2191_v6 = vadd.s32 4294967169, %v523_v62 }
  0xbf   :  { %v2175_v16 = vadd.s32 4294967169, %v111_v7  ;;  %v527_v18 = vor.u32 8388608, %v526_v11  ;;  %v218_v31 = vor.u32 8388608, %v2887_v19  ;;  %v416_v36 = vand.u32 2147483647, %v2859_v52 }
  0xc0   :  { %v220_v4 = vadd.s32 1, %v2179_v0  ;;  %v323_v5 = vadd.s32 1, %v2183_v1  ;;  %v426_v8 = vadd.s32 1, %v2187_v2  ;;  %v529_v15 = vadd.s32 1, %v2191_v6 }
  0xc1   :  { %v2902_v26 = vadd.s32 1, %v2175_v16  ;;  %v2906_v30 = vshll.u32 %v527_v18, 8  ;;  %v2734_v55 = vmov 2102212464  }
  0xc2   :  { %vm221_vm0 = vcmp.gt.s32.totalorder %v220_v4, 0  ;;  %vm324_vm1 = vcmp.gt.s32.totalorder %v323_v5, 0  ;;  %vm427_vm2 = vcmp.gt.s32.totalorder %v426_v8, 0  ;;  %vm530_vm3 = vcmp.gt.s32.totalorder %v529_v15, 0 }
  0xc3   :  { %v222_v9 = vsel %vm221_vm0, %v220_v4, 0  ;;  %v2872_v10 = vsel %vm324_vm1, %v323_v5, 0  ;;  %v2900_v25 = vsel %vm427_vm2, %v426_v8, 0  ;;  %v531_v27 = vsel %vm530_vm3, %v529_v15, 0 }
  0xc4   :  { %v2877_v13 = vand.u32 31, %v222_v9  ;;  %v2880_v14 = vand.u32 31, %v2872_v10  ;;  %v533_v29 = vand.u32 31, %v531_v27  ;;  %v2909_v32 = vshrl.u32 %v222_v9, 5 }
  0xc5   :  { %v2912_v33 = vand.u32 31, %v2900_v25  ;;  %v532_v37 = vshrl.u32 %v531_v27, 5  ;;  %vm118_vm7 = vcmp.gt.s32.totalorder %v2902_v26, 0 }
  0xc6   :  { %v2883_v17 = vsub.s32 32, %v2880_v14  ;;  %v2890_v20 = vsub.s32 32, %v2877_v13  ;;  %v2894_v22 = vshll.u32 %v2729_v21, %v2880_v14  ;;  %v534_v38 = vsub.s32 32, %v533_v29 }
  0xc7   :  { %v227_v39 = vshll.u32 %v2731_v34, %v2877_v13  ;;  %v536_v43 = vshll.u32 %v2731_v34, %v533_v29  ;;  %v539_v44 = vshll.u32 %v2732_v40, %v533_v29  ;;  %v542_v46 = vshll.u32 %v2733_v45, %v533_v29 }
  0xc8   :  { %v2898_v24 = vshrl.u32 %v2730_v23, %v2883_v17  ;;  %v2916_v35 = vshrl.u32 %v2731_v34, %v2890_v20  ;;  %v228_v41 = vshrl.u32 %v2732_v40, %v2890_v20  ;;  %v230_v47 = vshll.u32 %v2732_v40, %v2877_v13 }
  0xc9   :  { %v537_v48 = vshrl.u32 %v2732_v40, %v534_v38  ;;  %v540_v49 = vshrl.u32 %v2733_v45, %v534_v38  ;;  %v543_v56 = vshrl.u32 %v2734_v55, %v534_v38  ;;  %v545_v57 = vshll.u32 %v2734_v55, %v533_v29 }
  0xca   :  { %v344_v28 = vor.u32 %v2898_v24, %v2894_v22  ;;  %v535_v58 = vshrl.u32 %v2731_v34, %v534_v38  ;;  %v546_v59 = vshrl.u32 %v2729_v21, %v534_v38  ;;  %v548_v60 = vshll.u32 %v2729_v21, %v533_v29 }
  0xcb   :  { %v549_v61 = vshrl.u32 %v2730_v23, %v534_v38  ;;  %v538_v62 = vor.u32 %v537_v48, %v536_v43  ;;  %v541_v63 = vor.u32 %v540_v49, %v539_v44  ;;  %v544_v0 = vor.u32 %v543_v56, %v542_v46 }
  0xcc   :  { %vm551_vm4 = vcmp.lt.s32.totalorder %v532_v37, 1  ;;  %v547_v1 = vor.u32 %v546_v59, %v545_v57  ;;  %vm553_vm5 = vcmp.lt.s32.totalorder %v532_v37, 3  ;;  %vm554_vm6 = vcmp.lt.s32.totalorder %v532_v37, 4 }
  0xcd   :  { %v550_v2 = vor.u32 %v549_v61, %v548_v60  ;;  %v555_v4 = vsel %vm551_vm4, %v535_v58, %v538_v62  ;;  %v556_v5 = vsel %vm554_vm6, %v544_v0, 2102212464  ;;  %v559_v6 = vsel %vm551_vm4, %v538_v62, %v541_v63 }
  0xce   :  { %v563_v7 = vsel %vm551_vm4, %v541_v63, %v544_v0  ;;  %v557_v8 = vsel %vm553_vm5, %v541_v63, %v556_v5  ;;  %v560_v9 = vsel %vm554_vm6, %v547_v1, 920167782  ;;  %v231_v15 = vshrl.u32 %v2733_v45, %v2890_v20 }
  0xcf   :  { %v564_v11 = vsel %vm554_vm6, %v550_v2, 1326507024  ;;  %vm552_vm8 = vcmp.lt.s32.totalorder %v532_v37, 2  ;;  %v561_v16 = vsel %vm553_vm5, %v544_v0, %v560_v9  ;;  %v229_v27 = vor.u32 %v228_v41, %v227_v39 }
  0xd0   :  { %v565_v18 = vsel %vm553_vm5, %v547_v1, %v564_v11  ;;  %v558_v29 = vsel %vm552_vm8, %v555_v4, %v557_v8  ;;  %v562_v38 = vsel %vm552_vm8, %v559_v6, %v561_v16  ;;  %v233_v44 = vshll.u32 %v2733_v45, %v2877_v13 }
  0xd1   :  { %v566_v43 = vsel %vm552_vm8, %v563_v7, %v565_v18  ;;  %v2946_v49 = vmul.u32.u64.low %v2906_v30, %v562_v38  ;;  %v2947_v56 = vmul.u32.u64.high %v2906_v30, %v562_v38, %v2946_v49  ;;  %v232_v57 = vor.u32 %v231_v15, %v230_v47 }
  0xd2   :  { %v2942_v46 = vmul.u32.u64.low %v2906_v30, %v566_v43  ;;  %v2943_v48 = vmul.u32.u64.high %v2906_v30, %v566_v43, %v2942_v46  ;;  %v234_v37 = vshrl.u32 %v2734_v55, %v2890_v20  ;;  %v236_v39 = vshll.u32 %v2734_v55, %v2877_v13 }
  0xd3   :  { %v237_v41 = vshrl.u32 %v2729_v21, %v2890_v20  ;;  %v574_v58 = vmul.u32 %v2906_v30, %v558_v29  ;;  %v239_v59 = vshll.u32 %v2729_v21, %v2877_v13  ;;  %v240_v60 = vshrl.u32 %v2730_v23, %v2890_v20 }
  0xd4   :  { %vm242_vm9 = vcmp.lt.s32.totalorder %v2909_v32, 1  ;;  %v235_v47 = vor.u32 %v234_v37, %v233_v44  ;;  %vm244_vm10 = vcmp.lt.s32.totalorder %v2909_v32, 3  ;;  %vm245_vm11 = vcmp.lt.s32.totalorder %v2909_v32, 4 }
  0xd5   :  { %v238_v61 = vor.u32 %v237_v41, %v236_v39  ;;  %v2964_v62 = vadd.s32 %v2946_v49, %v2943_v48  ;;  %vm576_vm12 = vc.u32 %v2943_v48, %v2946_v49  ;;  %v577_v30 = vadd.s32 1, %v2947_v56 }
  0xd6   :  { %v241_v63 = vor.u32 %v240_v60, %v239_v59  ;;  %v247_v13 = vsel %vm245_vm11, %v235_v47, 2102212464  ;;  %v250_v20 = vsel %vm242_vm9, %v229_v27, %v232_v57  ;;  %v254_v1 = vsel %vm242_vm9, %v232_v57, %v235_v47 }
  0xd7   :  { %v251_v0 = vsel %vm245_vm11, %v238_v61, 920167782  ;;  %v578_v2 = vsel %vm576_vm12, %v577_v30, %v2947_v56  ;;  %vm243_vm13 = vcmp.lt.s32.totalorder %v2909_v32, 2  ;;  %v431_v6 = vsub.s32 32, %v2912_v33 }
  0xd8   :  { %v252_v4 = vsel %vm244_vm10, %v235_v47, %v251_v0  ;;  %v255_v5 = vsel %vm245_vm11, %v241_v63, 1326507024  ;;  %v579_v7 = vadd.s32 %v578_v2, %v574_v58  ;;  %v246_v11 = vsel %vm242_vm9, %v2916_v35, %v229_v27 }
  0xd9   :  { %v253_v8 = vsel %vm243_vm13, %v250_v20, %v252_v4  ;;  %v256_v9 = vsel %vm244_vm10, %v238_v61, %v255_v5  ;;  %v248_v15 = vsel %vm244_vm10, %v232_v57, %v247_v13  ;;  %v258_v18 = vshll.u32 %v218_v31, 8 }
  0xda   :  { %v257_v16 = vsel %vm243_vm13, %v254_v1, %v256_v9  ;;  %v2993_v29 = vsel %vm118_vm7, %v2902_v26, 0  ;;  %v2996_v38 = vshrl.u32 %v2900_v25, 5  ;;  %v580_v43 = vadd.s32 536870912, %v579_v7 }
  0xdb   :  { %v2998_v44 = vmul.u32.u64.low %v258_v18, %v257_v16  ;;  %v2999_v35 = vmul.u32.u64.high %v258_v18, %v257_v16, %v2998_v44  ;;  %v3001_v27 = vmul.u32.u64.low %v258_v18, %v253_v8  ;;  %v3002_v46 = vmul.u32.u64.high %v258_v18, %v253_v8, %v3001_v27 }
  0xdc   :  { %v3005_v48 = vshrl.u32 %v580_v43, 30  ;;  %v249_v19 = vsel %vm243_vm13, %v246_v11, %v248_v15  ;;  %v423_v26 = vand.u32 8388607, %v416_v36  ;;  %v434_v31 = vshrl.u32 %v2732_v40, %v431_v6 }
  0xdd   :  { %v433_v25 = vshll.u32 %v2731_v34, %v2912_v33  ;;  %v436_v49 = vshll.u32 %v2732_v40, %v2912_v33  ;;  %v437_v56 = vshrl.u32 %v2733_v45, %v431_v6  ;;  %v440_v57 = vshrl.u32 %v2734_v55, %v431_v6 }
  0xde   :  { %v582_v37 = vshll.u32 %v3005_v48, 30  ;;  %v439_v32 = vshll.u32 %v2733_v45, %v2912_v33  ;;  %v442_v39 = vshll.u32 %v2734_v55, %v2912_v33  ;;  %v443_v41 = vshrl.u32 %v2729_v21, %v431_v6 }
  0xdf   :  { %vm267_vm14 = vc.u32 %v2999_v35, %v3001_v27  ;;  %v268_v58 = vadd.s32 1, %v3002_v46  ;;  %v435_v59 = vor.u32 %v434_v31, %v433_v25  ;;  %v438_v60 = vor.u32 %v437_v56, %v436_v49 }
  0xe0   :  { %v583_v47 = vsub.s32 %v579_v7, %v582_v37  ;;  %v265_v61 = vmul.u32 %v258_v18, %v249_v19  ;;  %v432_v30 = vshrl.u32 %v2731_v34, %v431_v6  ;;  %v444_v63 = vor.u32 %v443_v41, %v442_v39 }
  0xe1   :  { %v269_v13 = vsel %vm267_vm14, %v268_v58, %v3002_v46  ;;  %v441_v20 = vor.u32 %v440_v57, %v439_v32  ;;  %v445_v0 = vshll.u32 %v2729_v21, %v2912_v33  ;;  %v446_v1 = vshrl.u32 %v2730_v23, %v431_v6 }
  0xe2   :  { %v585_v2 = vsub.s32 0, %v583_v47  ;;  %v270_v4 = vadd.s32 %v269_v13, %v265_v61  ;;  %v424_v5 = vor.u32 8388608, %v423_v26  ;;  %vm448_vm15 = vcmp.lt.s32.totalorder %v2996_v38, 1 }
  0xe3   :  { %v447_v8 = vor.u32 %v446_v1, %v445_v0  ;;  %vm449_vm0 = vcmp.lt.s32.totalorder %v2996_v38, 2  ;;  %vm451_vm1 = vcmp.lt.s32.totalorder %v2996_v38, 4  ;;  %v456_v7 = vsel %vm448_vm15, %v435_v59, %v438_v60 }
  0xe4   :  { %v2192_v9 = vmin.u32 %v585_v2, %v583_v47  ;;  %v271_v11 = vadd.s32 536870912, %v270_v4  ;;  %vm450_vm2 = vcmp.lt.s32.totalorder %v2996_v38, 3  ;;  %v457_v33 = vsel %vm451_vm1, %v444_v63, 920167782 }
  0xe5   :  { %v453_v15 = vsel %vm451_vm1, %v441_v20, 2102212464  ;;  %v458_v6 = vsel %vm450_vm2, %v441_v20, %v457_v33  ;;  %v460_v16 = vsel %vm448_vm15, %v438_v60, %v441_v20  ;;  %v461_v18 = vsel %vm451_vm1, %v447_v8, 1326507024 }
  0xe6   :  { %v587_v43 = vclz %v2192_v9  ;;  %v272_v44 = vshrl.u32 %v271_v11, 30  ;;  %v459_v46 = vsel %vm449_vm0, %v456_v7, %v458_v6  ;;  %v462_v19 = vsel %vm450_vm2, %v444_v63, %v461_v18 }
  0xe7   :  { %v3047_v26 = vand.u32 31, %v2993_v29  ;;  %v463_v31 = vsel %vm449_vm0, %v460_v16, %v462_v19  ;;  %v464_v25 = vshll.u32 %v424_v5, 8  ;;  %v452_v57 = vsel %vm448_vm15, %v432_v30, %v435_v59 }
  0xe8   :  { %v2193_v49 = vadd.s32 4294967294, %v587_v43  ;;  %v273_v56 = vshll.u32 %v272_v44, 30  ;;  %v454_v37 = vsel %vm450_vm2, %v438_v60, %v453_v15  ;;  %v3071_v30 = vshrl.u32 %v2993_v29, 5 }
  0xe9   :  { %v3055_v32 = vmul.u32.u64.low %v464_v25, %v463_v31  ;;  %v3056_v39 = vmul.u32.u64.high %v464_v25, %v463_v31, %v3055_v32  ;;  %v3058_v41 = vmul.u32.u64.low %v464_v25, %v459_v46  ;;  %v3059_v58 = vmul.u32.u64.high %v464_v25, %v459_v46, %v3058_v41 }
  0xea   :  { %vm2194_vm3 = vcmp.lt.s32.totalorder %v2193_v49, 0  ;;  %v3062_v61 = vsub.s32 %v270_v4, %v273_v56  ;;  %v3065_v63 = vsub.s32 32, %v3047_v26  ;;  %v455_v60 = vsel %vm449_vm0, %v452_v57, %v454_v37 }
  0xeb   :  { %v590_v13 = vsel %vm2194_vm3, 0, %v2193_v49  ;;  %vm212_vm4 = vcmp.lt.s32.totalorder %v2854_v50, 0  ;;  %vm473_vm5 = vc.u32 %v3056_v39, %v3058_v41  ;;  %v474_v8 = vadd.s32 1, %v3059_v58 }
  0xec   :  { %v591_v20 = vsub.s32 32, %v590_v13  ;;  %v595_v0 = vsub.s32 4294967266, %v590_v13  ;;  %v276_v59 = vsub.s32 0, %v3062_v61  ;;  %v592_v1 = vshll.u32 %v583_v47, %v590_v13 }
  0xed   :  { %v134_v38 = vshrl.u32 %v2729_v21, %v3065_v63  ;;  %v137_v29 = vshrl.u32 %v2730_v23, %v3065_v63  ;;  %v3084_v47 = vshrl.u32 %v2872_v10, 5  ;;  %v471_v7 = vmul.u32 %v464_v25, %v455_v60 }
  0xee   :  { %v593_v2 = vshrl.u32 %v2964_v62, %v591_v20  ;;  %v596_v4 = vadd.s32 127, %v595_v0  ;;  %v2180_v5 = vmin.u32 %v276_v59, %v3062_v61  ;;  %vm3088_vm6 = vcmp.le.f32.partialorder %v210_v12, 0.7853982 }
  0xef   :  { %v475_v15 = vsel %vm473_vm5, %v474_v8, %v3059_v58  ;;  %v133_v6 = vshll.u32 %v2734_v55, %v3047_v26  ;;  %v136_v23 = vshll.u32 %v2729_v21, %v3047_v26  ;;  %v296_v10 = vsub.s32 4, %v272_v44 }
  0xf0   :  { %v594_v9 = vor.u32 %v593_v2, %v592_v1  ;;  %v597_v11 = vshll.u32 %v596_v4, 23  ;;  %v278_v33 = vclz %v2180_v5  ;;  %v476_v16 = vadd.s32 %v475_v15, %v471_v7 }
  0xf1   :  { %vm142_vm7 = vcmp.lt.s32.totalorder %v3071_v30, 4  ;;  %v339_v18 = vshll.u32 %v2734_v55, %v2880_v14  ;;  %v340_v12 = vshrl.u32 %v2729_v21, %v2883_v17  ;;  %v135_v19 = vor.u32 %v134_v38, %v133_v6 }
  0xf2   :  { %v598_v43 = vor.u32 4788187, %v597_v11  ;;  %v2181_v46 = vadd.s32 4294967294, %v278_v33  ;;  %v138_v31 = vor.u32 %v137_v29, %v136_v23  ;;  %v266_v25 = vadd.s32 %v3001_v27, %v2999_v35 }
  0xf3   :  { %v477_v49 = vadd.s32 536870912, %v476_v16  ;;  %v601_v57 = vcvt.s32.f32 %v594_v9  ;;  %v107_v37 = vand.u32 2147483647, %v2864_v54  ;;  %v297_v58 = vsel %vm212_vm4, %v296_v10, %v272_v44 }
  0xf4   :  { %v599_v56 = vand.u32 2147483647, %v598_v43  ;;  %vm2182_vm8 = vcmp.lt.s32.totalorder %v2181_v46, 0  ;;  %v125_v21 = vshrl.u32 %v2732_v40, %v3065_v63  ;;  %v128_v35 = vshrl.u32 %v2733_v45, %v3065_v63 }
  0xf5   :  { %v281_v32 = vsel %vm2182_vm8, 0, %v2181_v46  ;;  %v3107_v13 = vshrl.u32 %v477_v49, 30  ;;  %v3115_v27 = vor.u32 %v340_v12, %v339_v18  ;;  %v124_v1 = vshll.u32 %v2731_v34, %v3047_v26 }
  0xf6   :  { %v3111_v20 = vmul.f32 %v601_v57, %v599_v56  ;;  %v282_v0 = vsub.s32 32, %v281_v32  ;;  %v286_v59 = vsub.s32 4294967266, %v281_v32  ;;  %v131_v44 = vshrl.u32 %v2734_v55, %v3065_v63 }
  0xf7   :  { %v479_v60 = vshll.u32 %v3107_v13, 30  ;;  %v283_v2 = vshll.u32 %v3062_v61, %v281_v32  ;;  %v127_v8 = vshll.u32 %v2732_v40, %v3047_v26  ;;  %v299_v38 = vsel %vm3088_vm6, 0, %v297_v58 }
  0xf8   :  { %v284_v4 = vshrl.u32 %v266_v25, %v282_v0  ;;  %v287_v5 = vadd.s32 127, %v286_v59  ;;  %v114_v7 = vand.u32 8388607, %v107_v37  ;;  %v130_v9 = vshll.u32 %v2733_v45, %v3047_v26 }
  0xf9   :  { %v3127_v29 = vsub.s32 %v476_v16, %v479_v60  ;;  %v126_v15 = vor.u32 %v125_v21, %v124_v1  ;;  %v129_v61 = vor.u32 %v128_v35, %v127_v8  ;;  %v148_v6 = vsel %vm142_vm7, %v135_v19, 920167782 }
  0xfa   :  { %v285_v11 = vor.u32 %v284_v4, %v283_v2  ;;  %v288_v33 = vshll.u32 %v287_v5, 23  ;;  %vm348_vm9 = vcmp.lt.s32.totalorder %v3084_v47, 4  ;;  %v132_v10 = vor.u32 %v131_v44, %v130_v9 }
  0xfb   :  { %v482_v23 = vsub.s32 0, %v3127_v29  ;;  %v152_v16 = vsel %vm142_vm7, %v138_v31, 1326507024  ;;  %v3142_v18 = vsel %vm348_vm9, %v3115_v27, 920167782  ;;  %v3144_v12 = vand.u32 3, %v299_v38 }
  0xfc   :  { %v289_v26 = vor.u32 4788187, %v288_v33  ;;  %v115_v46 = vor.u32 8388608, %v114_v7  ;;  %vm139_vm10 = vcmp.lt.s32.totalorder %v3071_v30, 1  ;;  %v292_v49 = vcvt.s32.f32 %v285_v11 }
  0xfd   :  { %v2188_v43 = vmin.u32 %v482_v23, %v3127_v29  ;;  %vm141_vm11 = vcmp.lt.s32.totalorder %v3071_v30, 3  ;;  %v147_v31 = vsel %vm139_vm10, %v126_v15, %v129_v61  ;;  %v824_v56 = vadd.s32 3, %v299_v38 }
  0xfe   :  { %v290_v25 = vand.u32 2147483647, %v289_v26  ;;  %vm418_vm12 = vcmp.lt.s32.totalorder %v2859_v52, 0  ;;  %v149_v32 = vsel %vm141_vm11, %v132_v10, %v148_v6  ;;  %v151_v58 = vsel %vm139_vm10, %v129_v61, %v132_v10 }
  0xff   :  { %v484_v57 = vclz %v2188_v43  ;;  %v123_v0 = vshrl.u32 %v2731_v34, %v3065_v63  ;;  %vm140_vm13 = vcmp.lt.s32.totalorder %v3071_v30, 2  ;;  %v144_v59 = vsel %vm142_vm7, %v132_v10, 2102212464 }
 0x100   :  { %v293_v21 = vmul.f32 %v292_v49, %v290_v25  ;;  %v150_v60 = vsel %vm140_vm13, %v147_v31, %v149_v32  ;;  %v153_v1 = vsel %vm141_vm11, %v135_v19, %v152_v16  ;;  %v155_v44 = vshll.u32 %v115_v46, 8 }
 0x101   :  { %v2189_v35 = vadd.s32 4294967294, %v484_v57  ;;  %v502_v4 = vsub.s32 4, %v3107_v13  ;;  %v143_v5 = vsel %vm139_vm10, %v123_v0, %v126_v15  ;;  %v154_v63 = vsel %vm140_vm13, %v151_v58, %v153_v1 }
 0x102   :  { %v294_v2 = vxor.u32 2147483648, %v293_v21  ;;  %v145_v8 = vsel %vm141_vm11, %v129_v61, %v144_v59  ;;  %v3172_v38 = vmul.u32.u64.low %v155_v44, %v154_v63  ;;  %v3173_v7 = vmul.u32.u64.high %v155_v44, %v154_v63, %v3172_v38 }
 0x103   :  { %vm2190_vm14 = vcmp.lt.s32.totalorder %v2189_v35, 0  ;;  %v3177_v11 = vmul.u32.u64.low %v155_v44, %v150_v60  ;;  %v3178_v33 = vmul.u32.u64.high %v155_v44, %v150_v60, %v3177_v11  ;;  %v472_v6 = vadd.s32 %v3058_v41, %v3056_v39 }
 0x104   :  { %v295_v19 = vsel %vm212_vm4, %v294_v2, %v293_v21  ;;  %v487_v9 = vsel %vm2190_vm14, 0, %v2189_v35  ;;  %v3186_v10 = vand.u32 3, %v824_v56  ;;  %v146_v16 = vsel %vm140_vm13, %v143_v5, %v145_v8 }
 0x105   :  { %v298_v15 = vsel %vm3088_vm6, %v2854_v50, %v295_v19  ;;  %v488_v23 = vsub.s32 32, %v487_v9  ;;  %v492_v61 = vsub.s32 4294967266, %v487_v9  ;;  %v313_v26 = vand.u32 2147483647, %v2857_v51 }
 0x106   :  { %2604 = vcosq.f32 %v298_v15  ;;  %v489_v43 = vshll.u32 %v3127_v29, %v487_v9  ;;  %v358_v39 = vsel %vm348_vm9, %v344_v28, 1326507024  ;;  %v503_v41 = vsel %vm418_vm12, %v502_v4, %v3107_v13 }
 0x107   :  { %2606 = vsinq.f32 %v298_v15  ;;  %v490_v46 = vshrl.u32 %v472_v6, %v488_v23  ;;  %v493_v25 = vadd.s32 127, %v492_v61  ;;  %vm164_vm15 = vc.u32 %v3173_v7, %v3177_v11 }
 0x108   :  { %v165_v30 = vadd.s32 1, %v3178_v33  ;;  %vm3205_vm0 = vcmp.le.f32.partialorder %v416_v36, 0.7853982  ;;  %v162_v24 = vmul.u32 %v155_v44, %v146_v16  ;;  %vm308_vm1 = vcmp.eq.s32.totalorder %v3144_v12, 2 }
 0x109   :  { %v491_v29 = vor.u32 %v490_v46, %v489_v43  ;;  %v494_v22 = vshll.u32 %v493_v25, 23  ;;  %v320_v13 = vand.u32 8388607, %v313_v26  ;;  %v331_v49 = vshrl.u32 %v2732_v40, %v2883_v17 }
 0x10a   :  { %v166_v28 = vsel %vm164_vm15, %v165_v30, %v3178_v33  ;;  %v334_v31 = vshrl.u32 %v2733_v45, %v2883_v17  ;;  %vm305_vm2 = vcmp.eq.s32.totalorder %v3144_v12, 0  ;;  %vm827_vm3 = vcmp.eq.s32.totalorder %v3186_v10, 0 }
 0x10b   :  { %v495_v36 = vor.u32 4788187, %v494_v22  ;;  %v505_v56 = vsel %vm3205_vm0, 0, %v503_v41  ;;  %v167_v57 = vadd.s32 %v166_v28, %v162_v24  ;;  %v333_v32 = vshll.u32 %v2732_v40, %v2880_v14 }
 0x10c   :  { %vm304_vm4 = vcmp.lt.s32.totalorder %v3144_v12, 2  ;;  %vm826_vm5 = vcmp.lt.s32.totalorder %v3186_v10, 2  ;;  %v498_v58 = vcvt.s32.f32 %v491_v29  ;;  %v330_v21 = vshll.u32 %v2731_v34, %v2880_v14 }
 0x10d   :  { %v336_v0 = vshll.u32 %v2733_v45, %v2880_v14  ;;  %v337_v59 = vshrl.u32 %v2734_v55, %v2883_v17  ;;  %vm302_vm6 = vweird.f32 %v2854_v50  ;;  %v496_v35 = vand.u32 2147483647, %v495_v36 }
 0x10e   :  { %v168_v60 = vadd.s32 536870912, %v167_v57  ;;  %v335_v1 = vor.u32 %v334_v31, %v333_v32  ;;  %vm347_vm7 = vcmp.lt.s32.totalorder %v3084_v47, 3  ;;  %v321_v40 = vor.u32 8388608, %v320_v13 }
 0x10f   :  { %v332_v44 = vor.u32 %v331_v49, %v330_v21  ;;  %v338_v2 = vor.u32 %v337_v59, %v336_v0  ;;  %v359_v4 = vsel %vm347_vm7, %v3115_v27, %v358_v39  ;;  %vm521_vm8 = vcmp.lt.s32.totalorder %v2862_v53, 0 }
 0x110   :  { %v603_v14 = vxor.u32 2147483648, %v3111_v20  ;;  %vm830_vm10 = vcmp.eq.s32.totalorder %v3186_v10, 2  ;;  %v499_v45 = vmul.f32 %v498_v58, %v496_v35  ;;  %v3239_v55 = vshrl.u32 %v168_v60, 30  ;;  %v2605_v5 = vpop.eup %2604 }
 0x111   :  { %v3241_v63 = vand.u32 3, %v505_v56  ;;  %v1032_v8 = vadd.s32 3, %v505_v56  ;;  %vm345_vm11 = vcmp.lt.s32.totalorder %v3084_v47, 1  ;;  %vm346_vm13 = vcmp.lt.s32.totalorder %v3084_v47, 2  ;;  %v2607_v38 = vpop.eup %2606 }
 0x112   :  { %v309_v19 = vxor.u32 2147483648, %v2605_v5  ;;  %v500_v27 = vxor.u32 2147483648, %v499_v45  ;;  %v170_v9 = vshll.u32 %v3239_v55, 30  ;;  %v357_v33 = vsel %vm345_vm11, %v335_v1, %v338_v2 }
 0x113   :  { %v306_v15 = vxor.u32 2147483648, %v2607_v38  ;;  %v353_v6 = vsel %vm345_vm11, %v332_v44, %v335_v1  ;;  %v355_v23 = vsel %vm347_vm7, %v338_v2, %v3142_v18  ;;  %v3253_v61 = vshll.u32 %v321_v40, 8 }
 0x114   :  { %v310_v16 = vsel %vm308_vm1, %v309_v19, %v2607_v38  ;;  %v832_v43 = vsel %vm830_vm10, %v309_v19, %v2607_v38  ;;  %v501_v46 = vsel %vm418_vm12, %v500_v27, %v499_v45  ;;  %v3261_v25 = vsub.s32 %v167_v57, %v170_v9 }
 0x115   :  { %v307_v39 = vsel %vm305_vm2, %v2605_v5, %v306_v15  ;;  %v829_v41 = vsel %vm827_vm3, %v2605_v5, %v306_v15  ;;  %v504_v18 = vsel %vm3205_vm0, %v2859_v52, %v501_v46  ;;  %v360_v30 = vsel %vm346_vm13, %v357_v33, %v359_v4 }
 0x116   :  { %v311_v29 = vsel %vm304_vm4, %v307_v39, %v310_v16  ;;  %v833_v22 = vsel %vm826_vm5, %v829_v41, %v832_v43  ;;  %2608 = vcosq.f32 %v504_v18  ;;  %v173_v24 = vsub.s32 0, %v3261_v25 }
 0x117   :  { %v3279_v28 = vsel %vm302_vm6, nan, %v311_v29  ;;  %v834_v62 = vsel %vm302_vm6, nan, %v833_v22  ;;  %2610 = vsinq.f32 %v504_v18  ;;  %v350_v13 = vsel %vm348_vm9, %v338_v2, 2102212464 }
 0x118   :  { %v1148_v49 = vpack.c.bf16 %v834_v62, %v834_v62  ;;  %v2176_v12 = vmin.u32 %v173_v24, %v3261_v25  ;;  %v329_v10 = vshrl.u32 %v2731_v34, %v2883_v17  ;;  %v356_v31 = vsel %vm346_vm13, %v353_v6, %v355_v23 }
 0x119   :  { %v604_v36 = vsel %vm521_vm8, %v603_v14, %v3111_v20  ;;  %v1033_v56 = vand.u32 3, %v1032_v8  ;;  %v3294_v50 = vmul.u32.u64.low %v3253_v61, %v360_v30  ;;  %v3295_v57 = vmul.u32.u64.high %v3253_v61, %v360_v30, %v3294_v50 }
 0x11a   :  { %1584 = vmatprep.mubr.bf16.mxu0 %v1148_v49  ;;  %v175_v32 = vclz %v2176_v12  ;;  %v349_v58 = vsel %vm345_vm11, %v329_v10, %v332_v44  ;;  %v351_v17 = vsel %vm347_vm7, %v335_v1, %v350_v13  ;;  %vm3307_vm9 = vcmp.le.f32.partialorder %v519_v3, 0.7853982 }
 0x11b   :  { %v3302_v34 = vmul.u32.u64.low %v3253_v61, %v356_v31  ;;  %v3303_v21 = vmul.u32.u64.high %v3253_v61, %v356_v31, %v3302_v34  ;;  %vm510_vm12 = vcmp.lt.s32.totalorder %v3241_v63, 2  ;;  %vm511_vm14 = vcmp.eq.s32.totalorder %v3241_v63, 0 }
 0x11c   :  { %v2177_v0 = vadd.s32 4294967294, %v175_v32  ;;  %v605_v59 = vsub.s32 4, %v3005_v48  ;;  %v607_v35 = vsel %vm3307_vm9, %v2862_v53, %v604_v36  ;;  %vm508_vm15 = vweird.f32 %v2859_v52  ;;  %v2562_v52 = vld [vmem:[#allocation2 + $0x20] sm:$0xff]  }
 0x11d   :  { %vm514_vm0 = vcmp.eq.s32.totalorder %v3241_v63, 2  ;;  %vm1038_vm1 = vcmp.eq.s32.totalorder %v1033_v56, 2  ;;  %v352_v3 = vsel %vm346_vm13, %v349_v58, %v351_v17  ;;  %v3322_v60 = vadd.s32 %v3302_v34, %v3295_v57 }
 0x11e   :  { %vm2178_vm2 = vcmp.lt.s32.totalorder %v2177_v0, 0  ;;  %vm370_vm3 = vc.u32 %v3295_v57, %v3302_v34  ;;  %v606_v1 = vsel %vm521_vm8, %v605_v59, %v3005_v48  ;;  %2612 = vcosq.f32 %v607_v35 }
 0x11f   :  { %v178_v40 = vsel %vm2178_vm2, 0, %v2177_v0  ;;  %v371_v44 = vadd.s32 1, %v3303_v21  ;;  %v608_v2 = vsel %vm3307_vm9, 0, %v606_v1  ;;  %2614 = vsinq.f32 %v607_v35 }
 0x120   :  { %v2609_v47 = vpop.eup %2608  ;;  %v163_v4 = vadd.s32 %v3177_v11, %v3173_v7  ;;  %v179_v14 = vsub.s32 32, %v178_v40  ;;  %v183_v45 = vsub.s32 4294967266, %v178_v40  ;;  %v368_v5 = vmul.u32 %v3253_v61, %v352_v3 }
 0x121   :  { %v2611_v8 = vpop.eup %2610  ;;  %v515_v38 = vxor.u32 2147483648, %v2609_v47  ;;  %v180_v48 = vshll.u32 %v3261_v25, %v178_v40  ;;  %v372_v19 = vsel %vm370_vm3, %v371_v44, %v3303_v21  ;;  %v1136_v27 = vadd.s32 3, %v608_v2 }
 0x122   :  { %v512_v9 = vxor.u32 2147483648, %v2611_v8  ;;  %v181_v33 = vshrl.u32 %v163_v4, %v179_v14  ;;  %v184_v15 = vadd.s32 127, %v183_v45  ;;  %v373_v6 = vadd.s32 %v372_v19, %v368_v5 }
 0x123   :  { %v516_v23 = vsel %vm514_vm0, %v515_v38, %v2611_v8  ;;  %vm1034_vm4 = vcmp.lt.s32.totalorder %v1033_v56, 2  ;;  %vm1035_vm5 = vcmp.eq.s32.totalorder %v1033_v56, 0  ;;  %v1040_v7 = vsel %vm1038_vm1, %v515_v38, %v2611_v8 }
 0x124   :  { %v513_v11 = vsel %vm511_vm14, %v2609_v47, %v512_v9  ;;  %v1037_v61 = vsel %vm1035_vm5, %v2609_v47, %v512_v9  ;;  %v182_v16 = vor.u32 %v181_v33, %v180_v48  ;;  %v185_v43 = vshll.u32 %v184_v15, 23 }
 0x125   :  { %v3343_v46 = vsel %vm510_vm12, %v513_v11, %v516_v23  ;;  %v1041_v25 = vsel %vm1034_vm4, %v1037_v61, %v1040_v7  ;;  %v374_v39 = vadd.s32 536870912, %v373_v6  ;;  %v1137_v41 = vand.u32 3, %v1136_v27 }
 0x126   :  { %v1042_v18 = vsel %vm508_vm15, nan, %v1041_v25  ;;  %v186_v30 = vor.u32 4788187, %v185_v43  ;;  %v612_v29 = vand.u32 3, %v608_v2  ;;  %v189_v49 = vcvt.s32.f32 %v182_v16 }
 0x127   :  { %v1150_v22 = vpack.c.bf16 %v1042_v18, %v1042_v18  ;;  %v3347_v24 = vshrl.u32 %v374_v39, 30  ;;  %v193_v63 = vsub.s32 4, %v3239_v55  ;;  %vm1139_vm6 = vcmp.eq.s32.totalorder %v1137_v41, 0 }
 0x128   :  { %v2613_v62 = vpop.eup %2612  ;;  %v187_v13 = vand.u32 2147483647, %v186_v30  ;;  %vm1142_vm7 = vcmp.eq.s32.totalorder %v1137_v41, 2  ;;  %vm617_vm8 = vcmp.eq.s32.totalorder %v612_v29, 2  ;;  %vm614_vm10 = vcmp.eq.s32.totalorder %v612_v29, 0 }
 0x129   :  { %v2615_v12 = vpop.eup %2614  ;;  %1624 = vmatprep.mubr.bf16.mxu1 %v1150_v22  ;;  %v376_v10 = vshll.u32 %v3347_v24, 30  ;;  %v618_v31 = vxor.u32 2147483648, %v2613_v62  ;;  %vm1138_vm11 = vcmp.lt.s32.totalorder %v1137_v41, 2  ;;  %vm109_vm13 = vcmp.lt.s32.totalorder %v2864_v54, 0  ;;  %v2549_v41 = vld [vmem:[#allocation5 + $0x100] sm:$0xff]  }
 0x12a   :  { %v190_v36 = vmul.f32 %v189_v49, %v187_v13  ;;  %v615_v56 = vxor.u32 2147483648, %v2615_v12  ;;  %vm613_vm9 = vcmp.lt.s32.totalorder %v612_v29, 2  ;;  %vm108_vm12 = vcmp.le.f32.partialorder %v107_v37, 0.7853982 }
 0x12b   :  { %v377_v50 = vsub.s32 %v373_v6, %v376_v10  ;;  %v1144_v57 = vsel %vm1142_vm7, %v618_v31, %v2615_v12  ;;  %v619_v32 = vsel %vm617_vm8, %v618_v31, %v2615_v12  ;;  %v194_v59 = vsel %vm109_vm13, %v193_v63, %v3239_v55  ;;  %v2555_v10 = vld [vmem:[#allocation5 + $0x110] sm:$0xff]  }
 0x12c   :  { %v191_v58 = vxor.u32 2147483648, %v190_v36  ;;  %v1141_v17 = vsel %vm1139_vm6, %v2613_v62, %v615_v56  ;;  %v616_v34 = vsel %vm614_vm10, %v2613_v62, %v615_v56  ;;  %v196_v40 = vsel %vm108_vm12, 0, %v194_v59  ;;  %v2552_v62 = vld [vmem:[#allocation5 + $0x108] sm:$0xff]  }
 0x12d   :  { %v379_v21 = vsub.s32 0, %v377_v50  ;;  %v3352_v20 = vsel %vm1138_vm11, %v1141_v17, %v1144_v57  ;;  %v3357_v35 = vsel %vm613_vm9, %v616_v34, %v619_v32  ;;  %v720_v47 = vadd.s32 3, %v196_v40 }
 0x12e   :  { %v192_v0 = vsel %vm109_vm13, %v191_v58, %v190_v36  ;;  %v200_v5 = vand.u32 3, %v196_v40  ;;  %vm199_vm0 = vweird.f32 %v2864_v54  ;;  %v399_v29 = vsub.s32 4, %v3347_v24  ;;  %v2558_v36 = vld [vmem:[#allocation5 + $0x118] sm:$0xff]  }
 0x12f   :  { %v195_v3 = vsel %vm108_vm12, %v2864_v54, %v192_v0  ;;  %v2184_v1 = vmin.u32 %v379_v21, %v377_v50  ;;  %v721_v37 = vand.u32 3, %v720_v47  ;;  %vm315_vm7 = vcmp.lt.s32.totalorder %v2857_v51, 0  ;;  %v2564_v21 = vld [vmem:[#allocation5 + $0x128] sm:$0xff]   ;;  %v2594_v54 = vld [vmem:[#allocation2 + $0xb8] sm:$0xff]  }
 0x130   :  { %2616 = vcosq.f32 %v195_v3  ;;  %vm202_vm1 = vcmp.eq.s32.totalorder %v200_v5, 0  ;;  %vm205_vm2 = vcmp.eq.s32.totalorder %v200_v5, 2  ;;  %vm201_vm5 = vcmp.lt.s32.totalorder %v200_v5, 2  ;;  %v2551_v47 = vld [vmem:[#allocation2 + $0x48] sm:$0xff]   ;;  %v2554_v5 = vld [vmem:[#allocation2 + $0x50] sm:$0xff]  }
 0x131   :  { %2618 = vsinq.f32 %v195_v3  ;;  %v381_v44 = vclz %v2184_v1  ;;  %vm726_vm3 = vcmp.eq.s32.totalorder %v721_v37, 2  ;;  %vm723_vm4 = vcmp.eq.s32.totalorder %v721_v37, 0 }
 0x132   :  { %vm722_vm6 = vcmp.lt.s32.totalorder %v721_v37, 2  ;;  %vm2735_vm8 = vmmov 0   ;;  %vm314_vm10 = vcmp.le.f32.partialorder %v313_v26, 0.7853982  ;;  %v400_v49 = vsel %vm315_vm7, %v399_v29, %v3347_v24  ;;  %v2561_v24 = vld [vmem:[#allocation5 + $0x120] sm:$0xff]   ;;  %v2570_v37 = vld [vmem:[#allocation5 + $0x138] sm:$0xff]  }
 0x133   :  { %v2185_v2 = vadd.s32 4294967294, %v381_v44  ;;  %v402_v63 = vsel %vm314_vm10, 0, %v400_v49  ;;  %v2550_v44 = vld [vmem:[#allocation2] sm:$0xff]   ;;  %v2571_v29 = vld [vmem:[#allocation2 + $0x38] sm:$0xff]  }
 0x134   :  { %v928_v31 = vadd.s32 3, %v402_v63  ;;  %v406_v26 = vand.u32 3, %v402_v63  ;;  %v2574_v49 = vld [vmem:[#allocation2 + $0x100] sm:$0xff]   ;;  %v2591_v63 = vld [vmem:[#allocation2 + $0xb0] sm:$0xff]  }
 0x135   :  { %vm2186_vm14 = vcmp.lt.s32.totalorder %v2185_v2, 0 }
 0x136   :  { %v384_v4 = vsel %vm2186_vm14, 0, %v2185_v2  ;;  %v929_v56 = vand.u32 3, %v928_v31  ;;  %vm411_vm11 = vcmp.eq.s32.totalorder %v406_v26, 2  ;;  %vm408_vm9 = vcmp.eq.s32.totalorder %v406_v26, 0  ;;  %v2577_v31 = vld [vmem:[#allocation2 + $0x108] sm:$0xff]  }
 0x137   :  { %v385_v14 = vsub.s32 32, %v384_v4  ;;  %v389_v45 = vsub.s32 4294967266, %v384_v4  ;;  %v386_v8 = vshll.u32 %v377_v50, %v384_v4  ;;  %vm407_vm14 = vcmp.lt.s32.totalorder %v406_v26, 2  ;;  %v2567_v4 = vld [vmem:[#allocation5 + $0x130] sm:$0xff]  }
 0x138   :  { %vm934_vm13 = vcmp.eq.s32.totalorder %v929_v56, 2  ;;  %vm931_vm12 = vcmp.eq.s32.totalorder %v929_v56, 0 }
 0x139   :  { %v387_v55 = vshrl.u32 %v3322_v60, %v385_v14  ;;  %v390_v38 = vadd.s32 127, %v389_v45  ;;  %v623_v14 = vpack.c.bf16 %v3279_v28, %v3279_v28  ;;  %v2553_v45 = vld [vmem:[#allocation2 + $0x8] sm:$0xff]   ;;  %v2556_v28 = vld [vmem:[#allocation2 + $0x10] sm:$0xff]  }
 0x13a   :  { %v2617_v48 = vpop.eup %2616 }
 0x13b   :  { %v2619_v19 = vpop.eup %2618  ;;  %v206_v27 = vxor.u32 2147483648, %v2617_v48  ;;  %v388_v9 = vor.u32 %v387_v55, %v386_v8  ;;  %v391_v33 = vshll.u32 %v390_v38, 23  ;;  %v2572_v8 = vld [vmem:[#allocation2 + $0xc0] sm:$0xff]   ;;  %v518_v38 = vsel %vm508_vm15, nan, %v3343_v46  ;;  %v2563_v46 = vld [vmem:[#allocation2 + $0x68] sm:$0xff]  }
 0x13c   :  { %v203_v15 = vxor.u32 2147483648, %v2619_v19 }
 0x13d   :  { %v207_v6 = vsel %vm205_vm2, %v206_v27, %v2619_v19  ;;  %v728_v23 = vsel %vm726_vm3, %v206_v27, %v2619_v19  ;;  %v392_v7 = vor.u32 4788187, %v391_v33  ;;  %v395_v25 = vcvt.s32.f32 %v388_v9  ;;  %v2573_v19 = vld [vmem:[#allocation2 + $0x80] sm:$0xff]   ;;  %v2575_v9 = vld [vmem:[#allocation2 + $0xc8] sm:$0xff]  }
 0x13e   :  { %v204_v11 = vsel %vm202_vm1, %v2617_v48, %v203_v15  ;;  %v725_v60 = vsel %vm723_vm4, %v2617_v48, %v203_v15  ;;  %vm930_vm1 = vcmp.lt.s32.totalorder %v929_v56, 2  ;;  %vm405_vm2 = vweird.f32 %v2857_v51  ;;  %v2557_v48 = vld [vmem:[#allocation2 + $0x58] sm:$0xff]  }
 0x13f   :  { %v3362_v61 = vsel %vm201_vm5, %v204_v11, %v207_v6  ;;  %v729_v16 = vsel %vm722_vm6, %v725_v60, %v728_v23  ;;  %v393_v43 = vand.u32 2147483647, %v392_v7  ;;  %vm611_vm3 = vweird.f32 %v2862_v53  ;;  %v2559_v15 = vld [vmem:[#allocation2 + $0x18] sm:$0xff]   ;;  %v2560_v6 = vld [vmem:[#allocation2 + $0x60] sm:$0xff]   ;;  %v2578_v23 = vld [vmem:[#allocation2 + $0xd0] sm:$0xff]  }
 0x140   :  { %v730_v39 = vsel %vm199_vm0, nan, %v729_v16  ;;  %v1146_v55 = vsel %vm611_vm3, nan, %v3352_v20  ;;  %v625_v33 = vpack.c.bf16 %v518_v38, %v518_v38  ;;  %v2576_v20 = vld [vmem:[#allocation2 + $0x88] sm:$0xff]   ;;  %v2579_v7 = vld [vmem:[#allocation2 + $0x90] sm:$0xff]   ;;  %v2581_v11 = vld [vmem:[#allocation2 + $0xd8] sm:$0xff]  }
 0x141   :  { %v1147_v18 = vpack.c.bf16 %v730_v39, %v730_v39  ;;  %v396_v30 = vmul.f32 %v395_v25, %v393_v43  ;;  %v1151_v27 = vpack.c.bf16 %v1146_v55, %v1146_v55  ;;  %v2565_v60 = vld [vmem:[#allocation2 + $0x28] sm:$0xff]   ;;  %v2566_v16 = vld [vmem:[#allocation2 + $0x70] sm:$0xff]   ;;  %v2582_v43 = vld [vmem:[#allocation2 + $0x98] sm:$0xff]  }
 0x142   :  { %v2584_v25 = vld [vmem:[#allocation2 + $0xe0] sm:$0xff]   ;;  %v2568_v39 = vld [vmem:[#allocation2 + $0x30] sm:$0xff]   ;;  %v2583_v56 = vld [vmem:[#allocation2 + $0x118] sm:$0xff]  }
 0x143   :  { %1585 = vmatmul.mubr.bf16.vlgmr.msra.gmra.mrb[0].mxu0 %v1147_v18  ;;  %v397_v22 = vxor.u32 2147483648, %v396_v30  ;;  %v2585_v18 = vld [vmem:[#allocation2 + $0xa0] sm:$0xff]   ;;  %v2601_v53 = vld [vmem:[#allocation7 + $0x28] sm:$0xff]  }
 0x144   :  { %2421 = vmatpush3.bf16.msra.mxu0 %v2549_v41  ;;  %2436 = vmatprep.mubr.msk.bf16.mxu0 %vm2735_vm8, %v2728_v42  ;;  %v2569_v41 = vld [vmem:[#allocation2 + $0x78] sm:$0xff]  }
 0x145   :  { %v398_v13 = vsel %vm315_vm7, %v397_v22, %v396_v30  ;;  %2422 = vmatprep.subr.bf16.mxu0 %v2728_v42  ;;  %v2587_v30 = vld [vmem:[#allocation2 + $0xe8] sm:$0xff]  }
 0x146   :  { %v401_v12 = vsel %vm314_vm10, %v2857_v51, %v398_v13  ;;  %v2588_v22 = vld [vmem:[#allocation2 + $0xa8] sm:$0xff]   ;;  %v2590_v13 = vld [vmem:[#allocation2 + $0xf0] sm:$0xff]  }
 0x147   :  { %2620 = vcosq.f32 %v401_v12  ;;  %v2589_v51 = vld [vmem:[#allocation2 + $0x128] sm:$0xff]  }
 0x148   :  { %2622 = vsinq.f32 %v401_v12  ;;  %2423 = vmatpush3.bf16.msra.mxu0 %v2552_v62  ;;  %v209_v62 = vsel %vm199_vm0, nan, %v3362_v61 }
 0x149   :  { %2424 = vmatprep.subr.bf16.mxu0 %v2728_v42  ;;  %v622_v12 = vpack.c.bf16 %v209_v62, %v209_v62 }
 0x14c   :  { %2425 = vmatpush3.bf16.msra.mxu0 %v2555_v10  ;;  %v2593_v10 = vld [vmem:[#allocation2 + $0xf8] sm:$0xff]  }
 0x14d   :  { %2426 = vmatprep.subr.bf16.mxu0 %v2728_v42 }
 0x150   :  { %2427 = vmatpush3.bf16.msra.mxu0 %v2558_v36  ;;  %v2580_v36 = vld [vmem:[#allocation2 + $0x110] sm:$0xff]  }
 0x151   :  { %v2621_v50 = vpop.eup %2620  ;;  %2428 = vmatprep.subr.bf16.mxu0 %v2728_v42 }
 0x152   :  { %v2623_v57 = vpop.eup %2622  ;;  %v412_v32 = vxor.u32 2147483648, %v2621_v50 }
 0x153   :  { %v409_v58 = vxor.u32 2147483648, %v2623_v57 }
 0x154   :  { %v413_v17 = vsel %vm411_vm11, %v412_v32, %v2623_v57  ;;  %v936_v34 = vsel %vm934_vm13, %v412_v32, %v2623_v57  ;;  %2429 = vmatpush3.bf16.msra.mxu0 %v2561_v24  ;;  %v2586_v24 = vld [vmem:[#allocation2 + $0x120] sm:$0xff]   ;;  %v2595_v57 = vld [vmem:[#allocation2 + $0x138] sm:$0xff]   ;;  %v621_v32 = vsel %vm611_vm3, nan, %v3357_v35 }
 0x155   :  { %v410_v0 = vsel %vm408_vm9, %v2621_v50, %v409_v58  ;;  %v933_v59 = vsel %vm931_vm12, %v2621_v50, %v409_v58  ;;  %2430 = vmatprep.subr.bf16.mxu0 %v2728_v42  ;;  %v2592_v50 = vld [vmem:[#allocation2 + $0x130] sm:$0xff]   ;;  %v626_v58 = vpack.c.bf16 %v621_v32, %v621_v32 }
 0x156   :  { %v3380_v3 = vsel %vm407_vm14, %v410_v0, %v413_v17  ;;  %v937_v1 = vsel %vm930_vm1, %v933_v59, %v936_v34  ;;  %v2596_v17 = vld [vmem:[#allocation7] sm:$0xff]   ;;  %v2597_v34 = vld [vmem:[#allocation7 + $0x8] sm:$0xff]   ;;  %v2599_v0 = vld [vmem:[#allocation7 + $0x18] sm:$0xff]  }
 0x157   :  { %v938_v40 = vsel %vm405_vm2, nan, %v937_v1  ;;  %v415_v61 = vsel %vm405_vm2, nan, %v3380_v3  ;;  %v2600_v59 = vld [vmem:[#allocation7 + $0x20] sm:$0xff]  }
 0x158   :  { %v1149_v2 = vpack.c.bf16 %v938_v40, %v938_v40  ;;  %2431 = vmatpush3.bf16.msra.mxu0 %v2564_v21  ;;  %v624_v26 = vpack.c.bf16 %v415_v61, %v415_v61  ;;  %v2598_v21 = vld [vmem:[#allocation7 + $0x10] sm:$0xff]  }
 0x159   :  { %2432 = vmatprep.subr.bf16.mxu0 %v2728_v42 }
 0x15a   :  { %1625 = vmatmul.mubr.bf16.vlgmr.msra.gmra.mrb[0].mxu1 %v1149_v2  ;;  %v2602_v2 = vld [vmem:[#allocation7 + $0x30] sm:$0xff]  }
 0x15b   :  { %2359 = vmatpush3.bf16.msra.mxu1 %v2550_v44  ;;  %1944 = vmatprep.mubr.bf16.mxu1 %v623_v14 }
 0x15c   :  { %2360 = vmatprep.subr.bf16.mxu1 %v2551_v47  ;;  %2433 = vmatpush3.bf16.msra.mxu0 %v2567_v4  ;;  %v2603_v47 = vld [vmem:[#allocation7 + $0x38] sm:$0xff]  }
 0x15d   :  { %2434 = vmatprep.subr.bf16.mxu0 %v2728_v42 }
 0x15f   :  { %2361 = vmatpush3.bf16.msra.mxu1 %v2553_v45 }
 0x160   :  { %2362 = vmatprep.subr.bf16.mxu1 %v2554_v5  ;;  %2435 = vmatpush3.bf16.msra.mxu0 %v2570_v37 }
 0x161   :  { %2380 = vmatprep.subr.bf16.mxu0 %v2572_v8 }
 0x163   :  { %2363 = vmatpush3.bf16.msra.mxu1 %v2556_v28  ;;  %2437 = vmatmul.mubr.bf16.vlgmr.msra.gmra.mrb[4].mxu0 %v1151_v27 }
 0x164   :  { %2364 = vmatprep.subr.bf16.mxu1 %v2557_v48  ;;  %2381 = vmatpush3.bf16.msra.mxu0 %v2573_v19 }
 0x165   :  { %1984 = vmatprep.mubr.bf16.mxu0 %v625_v33  ;;  %2382 = vmatprep.subr.bf16.mxu0 %v2575_v9 }
 0x167   :  { %2365 = vmatpush3.bf16.msra.mxu1 %v2559_v15 }
 0x168   :  { %2366 = vmatprep.subr.bf16.mxu1 %v2560_v6  ;;  %2383 = vmatpush3.bf16.msra.mxu0 %v2576_v20 }
 0x169   :  { %2384 = vmatprep.subr.bf16.mxu0 %v2578_v23 }
 0x16b   :  { %2367 = vmatpush3.bf16.msra.mxu1 %v2562_v52 }
 0x16c   :  { %2368 = vmatprep.subr.bf16.mxu1 %v2563_v46  ;;  %2385 = vmatpush3.bf16.msra.mxu0 %v2579_v7 }
 0x16d   :  { %2386 = vmatprep.subr.bf16.mxu0 %v2581_v11 }
 0x16f   :  { %2369 = vmatpush3.bf16.msra.mxu1 %v2565_v60 }
 0x170   :  { %2370 = vmatprep.subr.bf16.mxu1 %v2566_v16  ;;  %2387 = vmatpush3.bf16.msra.mxu0 %v2582_v43  ;;  %v2295_v16 = vld [vmem:[%s3446_s4] ss:$0 sm:$0xff]  ;;  %s2736_s4 = smov [#allocation8]  }
 0x171   :  { %2388 = vmatprep.subr.bf16.mxu0 %v2584_v25  ;;  %s2165_s14 = sshll.u32 %s2736_s4, 4  ;;  %s2166_s14 = int_to_ptr.vmem [resolvable:$true] %s2165_s14 }
 0x172   :  { %s2694_s20 = scalar_lea.vmem %s2166_s14, 128  ;;  %p2699_p11 = scmp.lt.s32.totalorder %s2166_s14, %s2166_s14 }
 0x173   :  { %2371 = vmatpush3.bf16.msra.mxu1 %v2568_v39  ;;  %p2695_p10 = scmp.ne.s32.totalorder %s2166_s14, %s2694_s20  ;;  %p2700_p12 = scmp.lt.s32.totalorder %s2694_s20, %s2694_s20 }
 0x174   :  { %2372 = vmatprep.subr.bf16.mxu1 %v2569_v41  ;;  %2389 = vmatpush3.bf16.msra.mxu0 %v2585_v18 }
 0x175   :  { %2390 = vmatprep.subr.bf16.mxu0 %v2587_v30  ;;  %p2701_p13 = por %p2700_p12, %p2699_p11 }
 0x177   :  { %2373 = vmatpush3.bf16.msra.mxu1 %v2571_v29  ;;  %p2702_p0 = pnand %p2701_p13, %p2695_p10 }
 0x178   :  { %2440 = vmatprep.subr.bf16.mxu1 %v2728_v42  ;;  %2391 = vmatpush3.bf16.msra.mxu0 %v2588_v22 }
 0x179   :  { %2392 = vmatprep.subr.bf16.mxu0 %v2590_v13 }
 0x17a   :  { %1945 = vmatmul.mubr.bf16.vlgmr.msra.gmra.mrb[4].mxu1 %v622_v12 }
 0x17b   :  { %2441 = vmatpush3.bf16.msra.mxu1 %v2574_v49  ;;  %2456 = vmatprep.mubr.msk.bf16.mxu1 %vm2735_vm8, %v2728_v42 }
 0x17c   :  { %2442 = vmatprep.subr.bf16.mxu1 %v2728_v42  ;;  %2393 = vmatpush3.bf16.msra.mxu0 %v2591_v63  ;;  %v2296_v63 = vld [vmem:[%s3448_s6] ss:$0 sm:$0xff] }
 0x17d   :  { %2394 = vmatprep.subr.bf16.mxu0 %v2593_v10 }
 0x17f   :  { %2443 = vmatpush3.bf16.msra.mxu1 %v2577_v31 }
 0x180   :  { %2444 = vmatprep.subr.bf16.mxu1 %v2728_v42  ;;  %2395 = vmatpush3.bf16.msra.mxu0 %v2594_v54 }
 0x181   :  { %2460 = vmatprep.subr.bf16.mxu0 %v2728_v42 }
 0x183   :  { %2445 = vmatpush3.bf16.msra.mxu1 %v2580_v36  ;;  %1985 = vmatmul.mubr.bf16.vlgmr.msra.gmra.mrb[8].mxu0 %v624_v26 }
 0x184   :  { %2446 = vmatprep.subr.bf16.mxu1 %v2728_v42  ;;  %2476 = vmatprep.mubr.msk.bf16.mxu0 %vm2735_vm8, %v2728_v42 }
 0x185   :  { %2461 = vmatpush3.bf16.msra.mxu0 %v2596_v17 }
 0x186   :  { %2462 = vmatprep.subr.bf16.mxu0 %v2728_v42 }
 0x187   :  { %2447 = vmatpush3.bf16.msra.mxu1 %v2583_v56 }
 0x188   :  { %2448 = vmatprep.subr.bf16.mxu1 %v2728_v42 }
 0x189   :  { %2463 = vmatpush3.bf16.msra.mxu0 %v2597_v34 }
 0x18a   :  { %2464 = vmatprep.subr.bf16.mxu0 %v2728_v42 }
 0x18b   :  { %2449 = vmatpush3.bf16.msra.mxu1 %v2586_v24 }
 0x18c   :  { %2450 = vmatprep.subr.bf16.mxu1 %v2728_v42 }
 0x18d   :  { %2465 = vmatpush3.bf16.msra.mxu0 %v2598_v21 }
 0x18e   :  { %2466 = vmatprep.subr.bf16.mxu0 %v2728_v42 }
 0x18f   :  { %2451 = vmatpush3.bf16.msra.mxu1 %v2589_v51 }
 0x190   :  { %2452 = vmatprep.subr.bf16.mxu1 %v2728_v42 }
 0x191   :  { %2467 = vmatpush3.bf16.msra.mxu0 %v2599_v0 }
 0x192   :  { %2468 = vmatprep.subr.bf16.mxu0 %v2728_v42 }
 0x193   :  { %2453 = vmatpush3.bf16.msra.mxu1 %v2592_v50 }
 0x194   :  { %2454 = vmatprep.subr.bf16.mxu1 %v2728_v42 }
 0x195   :  { %2469 = vmatpush3.bf16.msra.mxu0 %v2600_v59 }
 0x196   :  { %2470 = vmatprep.subr.bf16.mxu0 %v2728_v42 }
 0x197   :  { %2455 = vmatpush3.bf16.msra.mxu1 %v2595_v57 }
 0x199   :  { %2471 = vmatpush3.bf16.msra.mxu0 %v2601_v53 }
 0x19a   :  { %2457 = vmatmul.mubr.bf16.vlgmr.msra.gmra.mrb[8].mxu1 %v626_v58  ;;  %2472 = vmatprep.subr.bf16.mxu0 %v2728_v42 }
 0x19d   :  { %2473 = vmatpush3.bf16.msra.mxu0 %v2602_v2 }
 0x19e   :  { %2474 = vmatprep.subr.bf16.mxu0 %v2728_v42 }
 0x1a1   :  { %2475 = vmatpush3.bf16.msra.mxu0 %v2603_v47 }
 0x216   :  { %v2321_v35 = vpop.f32.mrb[0].mxu0 }
 0x217   :  { %v2322_v3 = vpop.f32.mrb[1].mxu0 }
 0x218   :  { %v2323_v1 = vadd.f32 %v2322_v3, %v2321_v35  ;;  %v2324_v40 = vpop.f32.mrb[2].mxu0 }
 0x219   :  { %v2325_v44 = vpop.f32.mrb[3].mxu0 }
 0x22d   :  { %v2343_v4 = vpop.f32.mrb[0].mxu1 }
 0x22e   :  { %v2344_v14 = vpop.f32.mrb[1].mxu1 }
 0x22f   :  { %v2345_v45 = vadd.f32 %v2344_v14, %v2343_v4  ;;  %v2346_v5 = vpop.f32.mrb[2].mxu1 }
 0x230   :  { %v2347_v37 = vpop.f32.mrb[3].mxu1 }
 0x231   :  { %v1627_v8 = vadd.f32 %v2345_v45, %v2323_v1 }
 0x236   :  { %v1666_v55 = vpop.f32.mrb[4].mxu0 }
 0x237   :  { %v1667_v28 = vadd.f32 %v1666_v55, %v1627_v8  ;;  %v2438_v38 = vpop.f32.mrb[5].mxu0 }
 0x238   :  { %v1669_v48 = vpop.f32.mrb[6].mxu0 }
 0x239   :  { %v2439_v19 = vpop.f32.mrb[7].mxu0 }
 0x24d   :  { %v2374_v27 = vpop.f32.mrb[4].mxu1 }
 0x24e   :  { %v2375_v9 = vpop.f32.mrb[5].mxu1 }
 0x24f   :  { %v2376_v33 = vadd.f32 %v2375_v9, %v2374_v27  ;;  %v2377_v15 = vpop.f32.mrb[6].mxu1 }
 0x250   :  { %v2378_v6 = vpop.f32.mrb[7].mxu1 }
 0x251   :  { %v1947_v20 = vadd.f32 %v2376_v33, %v1667_v28 }
 0x256   :  { %v2396_v23 = vpop.f32.mrb[8].mxu0 }
 0x257   :  { %v2397_v42 = vpop.f32.mrb[9].mxu0 }
 0x258   :  { %v2398_v52 = vadd.f32 %v2397_v42, %v2396_v23  ;;  %v2399_v46 = vpop.f32.mrb[10].mxu0 }
 0x259   :  { %v2400_v7 = vpop.f32.mrb[11].mxu0 }
 0x25a   :  { %v1987_v11 = vadd.f32 %v2398_v52, %v1947_v20 }
 0x26d   :  { %v2026_v60 = vpop.f32.mrb[8].mxu1 }
 0x26e   :  { %v2027_v43 = vadd.f32 %v2026_v60, %v1987_v11  ;;  %v2458_v25 = vpop.f32.mrb[9].mxu1 }
 0x26f   :  { %v2029_v39 = vpop.f32.mrb[10].mxu1 }
 0x270   :  { %v2039_v41 = vadd.f32 %v2295_v16, %v2027_v43  ;;  %v2459_v18 = vpop.f32.mrb[11].mxu1 }
 0x272   :  { %v2040_v30 = vsub.f32 0.0, %v2039_v41 }
 0x274   :  { %v2041_v29 = vmul.f32 1.442695, %v2040_v30 }
 0x276   :  { %2624 = vpow2.f32 %v2041_v29 }
 0x280   :  { %v2625_v22 = vpop.eup %2624 }
 0x281   :  { %v2043_v62 = vadd.f32 1.0, %v2625_v22 }
 0x283   :  { %2626 = vrcp.f32 %v2043_v62 }
 0x28d   :  { %v2627_v13 = vpop.eup %2626 }
 0x28e   :  { %v2045_v49 = vmul.f32 %v2627_v13, %v2039_v41 }
 0x290   :  { %v2046_v12 = vpack.c.bf16 %v2045_v49, %v2045_v49 }
 0x292   :  { %2477 = vmatmul.mubr.bf16.vlgmr.msra.gmra.mrb[12].mxu0 %v2046_v12 }
 0x365   :  { %v2152_v10 = vpop.f32.mrb[12].mxu0 }
 0x366   :  { %v2153_v31 = vadd.f32 %v2296_v63, %v2152_v10  ;;  %v2478_v54 = vpop.f32.mrb[13].mxu0 }
 0x367   :  { %v2155_v61 = vpop.f32.mrb[14].mxu0 }
 0x368   :  { %2158 = vst [vmem:[#allocation8] sm:$0xff] %v2153_v31  ;;  %v2479_v36 = vpop.f32.mrb[15].mxu0 }
 0x369   :  { %2705 = shalt.err (!%p2702_p0)
}
 0x36a   :  { %s2706_s6 = scalar_lea.hbm %s3449_s7, 128 }
 0x36b   :  { %p2707_p1 = scmp.ne.s32.totalorder %s3449_s7, %s2706_s6  ;;  %p2710_p2 = scmp.lt.u32.totalorder %s2706_s6, %s3449_s7 }
 0x36d   :  { %p2712_p3 = pnand %p2710_p2, %p2707_p1 }
 0x36f   :  { %2715 = shalt.err (!%p2712_p3)
}
 0x370   :  { %2168 = dma.vmem_to_hbm [thread:$0]  %s2166_s14, 128, %s3449_s7, [#allocation4]  }
 0x371   :  { %2720 = dma.done.wait [#allocation4], 128  }
 0x372   :  { %2721 = vsyncadd [#allocation4], 4294967168 }
 0x373   :  { %2172 = vsyncpa [#allocation3], 1 }
 0x374   :  { %2173 = vsyncpa [#allocation6], 1 }
 0x375   :  { %2174 = vsyncpa [#allocation4], 1 }

</bundles_post_ra>
